<compile_context>
chip_gen: v7x
topology: tpu7x:2x2x1
jax: 0.10.0
libtpu: 0.0.40
codegen_flags: <defaults>
</compile_context>

<pallas_src>
import math
import functools

import jax
import jax.numpy as jnp
from jax.experimental import pallas as pl
from jax.experimental.pallas import tpu as pltpu


MATMUL_DTYPE = jnp.bfloat16      # MXU operand dtype (f32 accumulation)
ACT_DTYPE = jnp.bfloat16         # inter-kernel activation storage dtype
HEAD_W = 128                     # lane-dense padded width of fused head output
_TARGET_ROWS = 256               # desired LHS rows per grid step


def _vmem_limit_bytes():
    # Per-generation VMEM budget: ~3/4 of physical capacity
    # (96 MiB on v5e/v6e's 128 MiB, 48 MiB on v7x's 64 MiB).
    try:
        info = pltpu.get_tpu_info()
        return int(info.vmem_capacity_bytes * 3 // 4)
    except Exception:
        return 32 * 1024 * 1024  # conservative, known-safe fallback


_VMEM_LIMIT = _vmem_limit_bytes()


def _compiler_params(dim_sem):
    return pltpu.CompilerParams(
        dimension_semantics=dim_sem,
        vmem_limit_bytes=_VMEM_LIMIT,
    )


def _const_spec(arr):
    """Grid-invariant parameter (1-D grids only): full-array block, the same
    block every step, single-buffered (constants don't need double buffers)."""
    zeros = (0,) * arr.ndim
    return pl.BlockSpec(arr.shape, lambda i, _z=zeros: _z,
                        pipeline_mode=pl.Buffered(1))


def _pick_bblk(B, T, sublane, target_rows=_TARGET_ROWS):
    """Largest divisor of B s.t. bblk*T rows fit the target slab and respect
    sublane tiling; prefer >=2 grid steps on the parallel batch axis (v7x)."""
    divs = [d for d in range(1, B + 1) if B % d == 0]
    ok = [d for d in divs if (d * T) % sublane == 0] or [B]
    fit = [d for d in ok if d * T <= target_rows] or [min(ok)]
    two = [d for d in fit if B // d >= 2]
    return max(two) if two else max(fit)


# --------------------------------------------------------------------------
# In-kernel helpers (trace-time inlined)
# --------------------------------------------------------------------------
def _layernorm(x, g, b, eps=1e-5):
    # two-pass (mean-subtract first) for parity with torch.nn.LayerNorm
    mean = jnp.mean(x, axis=-1, keepdims=True)
    xc = x - mean
    var = jnp.mean(xc * xc, axis=-1, keepdims=True)
    return xc * jax.lax.rsqrt(var + eps) * g + b


def _mm(x, w):
    # bf16 MXU operands, f32 accumulation
    return jnp.dot(x.astype(MATMUL_DTYPE), w.astype(MATMUL_DTYPE),
                   preferred_element_type=jnp.float32)


# --------------------------------------------------------------------------
# Kernel 1: input projection + input LayerNorm + positional encoding
#   (row-slab grid over flattened B*T; pe is pre-tiled to one slab on host)
# --------------------------------------------------------------------------
def _input_stage_kernel(x_ref, w_ref, b_ref, g_ref, beta_ref, pe_ref, o_ref):
    y = _mm(x_ref[...], w_ref[...]) + b_ref[...]          # [rows_blk, D] f32
    y = _layernorm(y, g_ref[...], beta_ref[...])
    o_ref[...] = (y + pe_ref[...]).astype(o_ref.dtype)


def input_stage(x_flat, w, b, g, beta, pe_tiled, *, rows_blk):
    rows, Cin = x_flat.shape
    D = w.shape[1]
    params = (w, b, g, beta, pe_tiled)
    in_specs = [pl.BlockSpec((rows_blk, Cin), lambda i: (i, 0))]
    in_specs += [_const_spec(a) for a in params]
    return pl.pallas_call(
        _input_stage_kernel,
        grid=(rows // rows_blk,),
        in_specs=in_specs,
        out_specs=pl.BlockSpec((rows_blk, D), lambda i: (i, 0)),
        out_shape=jax.ShapeDtypeStruct((rows, D), ACT_DTYPE),
        compiler_params=_compiler_params(("parallel",)),
    )(x_flat, *params)


# --------------------------------------------------------------------------
# Kernel 2: the FULL pre-norm Transformer encoder stack (all L layers fused)
#   grid = (batch_blocks, L); residual stream resident in VMEM scratch.
# --------------------------------------------------------------------------
def _encoder_stack_kernel(h_ref, bias_ref,
                          lnv_ref, wqkv_ref, bqkv_ref, wo_ref,
                          w1_ref, b1_ref, w2_ref,
                          o_ref,
                          h_sc, attn_sc,
                          *, num_heads, head_dim, bblk, T):
    l = pl.program_id(1)
    D = num_heads * head_dim
    scale = 1.0 / math.sqrt(head_dim)

    # load the batch block into the resident f32 residual-stream scratch
    @pl.when(l == 0)
    def _():
        h_sc[...] = h_ref[...].astype(jnp.float32)

    # stacked per-layer LN params / small biases: one [6, D] operand
    lnv = lnv_ref[0]
    n1g, n1b = lnv[0:1], lnv[1:2]
    n2g, n2b = lnv[2:3], lnv[3:4]
    bo, b2 = lnv[4:5], lnv[5:6]

    x = h_sc[...]                                          # [rows_blk, D] f32

    # --- self-attention block (pre-norm), fused QKV projection ------------
    n1 = _layernorm(x, n1g, n1b)
    qkv = _mm(n1, wqkv_ref[0]) + bqkv_ref[0]               # [rows_blk, 3D] f32
    # fold 1/sqrt(head_dim) into Q once (not per head / per score matrix)
    q = (qkv[:, :D] * scale).astype(MATMUL_DTYPE)
    k = qkv[:, D:2 * D].astype(MATMUL_DTYPE)
    v = qkv[:, 2 * D:].astype(MATMUL_DTYPE)

    # TODO(synk): for deployed configs with head_dim << 128, pack several
    # heads into one MXU contraction (block-diagonal K) to fill the MXU.
    for b in range(bblk):
        rs = slice(b * T, (b + 1) * T)
        # hoist the key-bias broadcast out of the per-head loop
        bias2d = jnp.broadcast_to(bias_ref[b], (T, T))     # [T, T] f32
        qb, kb, vb = q[rs], k[rs], v[rs]
        for hd in range(num_heads):
            cs = slice(hd * head_dim, (hd + 1) * head_dim)
            # contract last dims: no explicit k.T / XLU transpose
            s = jax.lax.dot_general(qb[:, cs], kb[:, cs],
                                    (((1,), (1,)), ((), ())),
                                    preferred_element_type=jnp.float32)
            s = s + bias2d
            s = s - jnp.max(s, axis=-1, keepdims=True)
            p = jnp.exp(s)
            p = p * pl.reciprocal(jnp.sum(p, axis=-1, keepdims=True),
                                  approx=True)
            # write the head output straight into its slot (no concat,
            # bounded live ranges, no simultaneously-live head outputs)
            attn_sc[rs, cs] = jnp.dot(p.astype(MATMUL_DTYPE), vb[:, cs],
                                      preferred_element_type=jnp.float32)

    # output projection + residual (all in-VMEM, no HBM round trip)
    h1 = x + _mm(attn_sc[...], wo_ref[0]) + bo

    # --- feed-forward block (pre-norm) + residual --------------------------
    n2 = _layernorm(h1, n2g, n2b)
    ff = jnp.maximum(_mm(n2, w1_ref[0]) + b1_ref[0], 0.0)
    ff = _mm(ff, w2_ref[0]) + b2
    h_new = h1 + ff
    h_sc[...] = h_new

    @pl.when(l == pl.num_programs(1) - 1)
    def _():
        o_ref[...] = h_new.astype(o_ref.dtype)


def encoder_stack(h_flat, key_bias, ep, num_heads, *, T, bblk):
    rows, D = h_flat.shape
    B = rows // T
    L = ep["wqkv"].shape[0]
    F = ep["w1"].shape[-1]
    Dh = D // num_heads
    rows_blk = bblk * T

    kernel = functools.partial(_encoder_stack_kernel, num_heads=num_heads,
                               head_dim=Dh, bblk=bblk, T=T)
    in_specs = [
        pl.BlockSpec((rows_blk, D), lambda b, l: (b, 0)),      # h (resident over l)
        pl.BlockSpec((bblk, 1, T), lambda b, l: (b, 0, 0)),    # key-padding bias
        pl.BlockSpec((1, 6, D), lambda b, l: (l, 0, 0)),       # stacked LN vecs/biases
        pl.BlockSpec((1, D, 3 * D), lambda b, l: (l, 0, 0)),   # wqkv
        pl.BlockSpec((1, 1, 3 * D), lambda b, l: (l, 0, 0)),   # bqkv
        pl.BlockSpec((1, D, D), lambda b, l: (l, 0, 0)),       # wo
        pl.BlockSpec((1, D, F), lambda b, l: (l, 0, 0)),       # w1
        pl.BlockSpec((1, 1, F), lambda b, l: (l, 0, 0)),       # b1
        pl.BlockSpec((1, F, D), lambda b, l: (l, 0, 0)),       # w2
    ]
    return pl.pallas_call(
        kernel,
        grid=(B // bblk, L),
        in_specs=in_specs,
        out_specs=pl.BlockSpec((rows_blk, D), lambda b, l: (b, 0)),
        out_shape=jax.ShapeDtypeStruct((rows, D), ACT_DTYPE),
        scratch_shapes=[pltpu.VMEM((rows_blk, D), jnp.float32),   # residual h
                        pltpu.VMEM((rows_blk, D), jnp.float32)],  # attn output
        compiler_params=_compiler_params(("parallel", "arbitrary")),
    )(h_flat, key_bias, ep["lnv"], ep["wqkv"], ep["bqkv"], ep["wo"],
      ep["w1"], ep["b1"], ep["w2"])


# --------------------------------------------------------------------------
# Kernel 3: encoder_norm + feature_map + cls_head + reg_head (fused tail)
#   purely row-wise -> flattened B*T rows, lane-dense fused head output.
# --------------------------------------------------------------------------
def _tail_kernel(h_ref, dvec_ref, hvec_ref,
                 fmw_ref, cw1_ref, cw2_ref, rw1_ref, rw2_ref,
                 w3_ref, b3_ref,
                 feats_ref, head_ref):
    dv = dvec_ref[...]                                      # [9, D]
    encg, encb = dv[0:1], dv[1:2]
    fmb = dv[2:3]
    fmg, fmbeta = dv[3:4], dv[4:5]
    clsg, clsb = dv[5:6], dv[6:7]
    regg, regb = dv[7:8], dv[8:9]
    hv = hvec_ref[...]                                      # [4, hidden]
    cb1, cb2, rb1, rb2 = hv[0:1], hv[1:2], hv[2:3], hv[3:4]

    x = h_ref[...].astype(jnp.float32)
    enc = _layernorm(x, encg, encb)

    # feature_map: Linear -> LayerNorm -> ReLU (dropout = identity)
    f = _mm(enc, fmw_ref[...]) + fmb
    f = jnp.maximum(_layernorm(f, fmg, fmbeta), 0.0)
    feats_ref[...] = f

    # cls_head trunk: LN -> Linear+ReLU -> Linear+ReLU
    c = _layernorm(f, clsg, clsb)
    c = jnp.maximum(_mm(c, cw1_ref[...]) + cb1, 0.0)
    c = jnp.maximum(_mm(c, cw2_ref[...]) + cb2, 0.0)

    # reg_head trunk: LN -> Linear+ReLU -> Linear+ReLU
    r = _layernorm(f, regg, regb)
    r = jnp.maximum(_mm(r, rw1_ref[...]) + rb1, 0.0)
    r = jnp.maximum(_mm(r, rw2_ref[...]) + rb2, 0.0)

    # Final projections fused into one lane-dense (128-wide) matmul:
    # w3 is block-diagonal [2*hidden, HEAD_W]; col 0 = cls logit,
    # cols 1:3 = reg offsets, the rest zero.
    cr = jnp.concatenate([c, r], axis=-1)
    head = _mm(cr, w3_ref[...]) + b3_ref[...]
    # reg columns (>=1) get the trailing ReLU; the cls logit (col 0) does not.
    col = jax.lax.broadcasted_iota(jnp.int32, head.shape, 1)
    head_ref[...] = jnp.where(col >= 1, jnp.maximum(head, 0.0), head)


def tail_stage(h_flat, p, *, B, T):
    rows, D = h_flat.shape
    slab = rows if rows <= 512 else 512
    params = (p["tail_dvec"], p["tail_hvec"], p["fm_w"], p["cls_w1"],
              p["cls_w2"], p["reg_w1"], p["reg_w2"], p["head_w3"], p["head_b3"])
    in_specs = [pl.BlockSpec((slab, D), lambda i: (i, 0))]
    in_specs += [_const_spec(a) for a in params]
    feats, head = pl.pallas_call(
        _tail_kernel,
        grid=(pl.cdiv(rows, slab),),
        in_specs=in_specs,
        out_specs=[pl.BlockSpec((slab, D), lambda i: (i, 0)),
                   pl.BlockSpec((slab, HEAD_W), lambda i: (i, 0))],
        out_shape=(jax.ShapeDtypeStruct((rows, D), jnp.float32),
                   jax.ShapeDtypeStruct((rows, HEAD_W), jnp.float32)),
        compiler_params=_compiler_params(("parallel",)),
    )(h_flat, *params)
    return feats.reshape(B, T, D), head.reshape(B, T, HEAD_W)


# --------------------------------------------------------------------------
# Parameter initialization (Xavier-uniform like _init_weights)
# --------------------------------------------------------------------------
def _xavier(key, fan_in, fan_out):
    limit = math.sqrt(6.0 / (fan_in + fan_out))
    return jax.random.uniform(key, (fan_in, fan_out), jnp.float32, -limit, limit)


def make_positional_encoding(max_len, d_model):
    position = jnp.arange(max_len, dtype=jnp.float32)[:, None]
    div_term = jnp.exp(
        jnp.arange(0, d_model, 2, dtype=jnp.float32) * (-math.log(10000.0) / d_model)
    )
    pe = jnp.zeros((max_len, d_model), jnp.float32)
    pe = pe.at[:, 0::2].set(jnp.sin(position * div_term))
    pe = pe.at[:, 1::2].set(jnp.cos(position * div_term))
    return pe


def init_params(key, vis_dim, aud_dim, text_dim, d_model, self_num_layers,
                d_ff, hidden_dim=256, max_len=64):
    concat_dim = vis_dim + aud_dim + text_dim
    keys = iter(jax.random.split(key, 16 + 8 * self_num_layers))
    wdt = MATMUL_DTYPE
    f32 = jnp.float32
    ones_d = jnp.ones((d_model,), f32)
    zeros_d = jnp.zeros((d_model,), f32)

    p = {}
    p["in_proj_w"] = _xavier(next(keys), concat_dim, d_model).astype(wdt)
    p["in_proj_b"] = jnp.zeros((1, d_model), f32)
    p["in_norm_g"] = jnp.ones((1, d_model), f32)
    p["in_norm_b"] = jnp.zeros((1, d_model), f32)
    p["pe"] = make_positional_encoding(max_len, d_model)

    # --- encoder stack: per-layer weights stacked along a leading L axis ---
    lnv, wqkv, bqkv, wo, w1, b1, w2 = [], [], [], [], [], [], []
    for _ in range(self_num_layers):
        wq = _xavier(next(keys), d_model, d_model)
        wk = _xavier(next(keys), d_model, d_model)
        wv = _xavier(next(keys), d_model, d_model)
        wqkv.append(jnp.concatenate([wq, wk, wv], axis=1).astype(wdt))
        bqkv.append(jnp.zeros((1, 3 * d_model), f32))
        wo.append(_xavier(next(keys), d_model, d_model).astype(wdt))
        w1.append(_xavier(next(keys), d_model, d_ff).astype(wdt))
        b1.append(jnp.zeros((1, d_ff), f32))
        w2.append(_xavier(next(keys), d_ff, d_model).astype(wdt))
        # rows: norm1_g, norm1_b, norm2_g, norm2_b, out_proj_b, ffn_b2
        lnv.append(jnp.stack([ones_d, zeros_d, ones_d, zeros_d,
                              zeros_d, zeros_d]))
    p["enc"] = {
        "lnv": jnp.stack(lnv),      # [L, 6, D]  f32
        "wqkv": jnp.stack(wqkv),    # [L, D, 3D] bf16
        "bqkv": jnp.stack(bqkv),    # [L, 1, 3D] f32
        "wo": jnp.stack(wo),        # [L, D, D]  bf16
        "w1": jnp.stack(w1),        # [L, D, F]  bf16
        "b1": jnp.stack(b1),        # [L, 1, F]  f32
        "w2": jnp.stack(w2),        # [L, F, D]  bf16
    }

    # --- tail: encoder_norm + feature_map + cls/reg heads -----------------
    p["fm_w"] = _xavier(next(keys), d_model, d_model).astype(wdt)
    p["cls_w1"] = _xavier(next(keys), d_model, hidden_dim).astype(wdt)
    p["cls_w2"] = _xavier(next(keys), hidden_dim, hidden_dim).astype(wdt)
    p["reg_w1"] = _xavier(next(keys), d_model, hidden_dim).astype(wdt)
    p["reg_w2"] = _xavier(next(keys), hidden_dim, hidden_dim).astype(wdt)
    # stacked D-sized vectors: enc_g, enc_b, fm_b, fm_g, fm_beta,
    #                          cls_g, cls_b, reg_g, reg_b
    p["tail_dvec"] = jnp.stack([ones_d, zeros_d, zeros_d, ones_d, zeros_d,
                                ones_d, zeros_d, ones_d, zeros_d])
    # stacked hidden-sized biases: cls_b1, cls_b2, reg_b1, reg_b2
    p["tail_hvec"] = jnp.zeros((4, hidden_dim), f32)

    # final projections packed block-diagonally into a lane-dense weight
    cls_w3 = _xavier(next(keys), hidden_dim, 1)
    reg_w3 = _xavier(next(keys), hidden_dim, 2)
    w3 = jnp.zeros((2 * hidden_dim, HEAD_W), f32)
    w3 = w3.at[:hidden_dim, 0:1].set(cls_w3)
    w3 = w3.at[hidden_dim:, 1:3].set(reg_w3)
    p["head_w3"] = w3.astype(wdt)
    p["head_b3"] = jnp.zeros((1, HEAD_W), f32)
    return p


# --------------------------------------------------------------------------
# Forward pass (norm_first TransformerEncoder, batch_first)
# --------------------------------------------------------------------------
def mmc_forward(params, batch, num_heads):
    visual = batch["visual_feats"]
    audio = batch["audio_feats"]
    text = batch["text_feats"]
    masks = batch["masks"]                                  # [B, 1, T]

    B, T, _ = visual.shape
    sublane = 16 if jnp.dtype(ACT_DTYPE).itemsize == 2 else 8
    bblk = _pick_bblk(B, T, sublane)
    rows_blk = bblk * T

    # cast raw features to bf16 on host (matmul operands are bf16 anyway),
    # flatten B*T once (free metadata reshape)
    x_flat = jnp.concatenate(
        [visual.astype(ACT_DTYPE), audio.astype(ACT_DTYPE),
         text.astype(ACT_DTYPE)], axis=-1).reshape(B * T, -1)
    pe_tiled = jnp.tile(params["pe"][:T], (bblk, 1))        # [rows_blk, D]

    # fused: input projection -> input LayerNorm -> + positional encoding
    h = input_stage(x_flat, params["in_proj_w"], params["in_proj_b"],
                    params["in_norm_g"], params["in_norm_b"],
                    pe_tiled, rows_blk=rows_blk)

    # src_key_padding_mask = (masks == 0).squeeze(1); True -> masked key.
    # Fully masked rows produce a uniform softmax here (PyTorch yields NaN).
    pad = masks[:, 0, :] == 0
    key_bias = jnp.where(pad, -1e9, 0.0).astype(jnp.float32)[:, None, :]

    # fused: ALL encoder layers in one pallas_call (h resident in VMEM)
    h = encoder_stack(h, key_bias, params["enc"], num_heads, T=T, bblk=bblk)

    # fused: encoder_norm -> feature_map -> cls_head + reg_head
    feats, head = tail_stage(h, params, B=B, T=T)
    out_cls_logits = head[..., 0:1]                         # [B, T, 1]
    out_offsets = head[..., 1:3]                            # [B, T, 2]

    # TODO(synk): losses() / soft-NMS inference helpers are host-side
    # post-processing and are intentionally not implemented as kernels.
    return (masks, out_cls_logits, out_offsets, batch["labels"],
            batch["segments"], feats)


# --------------------------------------------------------------------------
# Main
# --------------------------------------------------------------------------
if __name__ == "__main__":
    # small, module-consistent shapes; d_model=128 keeps all stores lane-dense
    B, T = 2, 8
    vis_dim, aud_dim, text_dim = 16, 8, 8
    d_model, num_heads, d_ff = 128, 4, 256
    self_num_layers = 2

    key = jax.random.PRNGKey(0)
    k_param, k_v, k_a, k_t, k_seg = jax.random.split(key, 5)

    params = init_params(k_param, vis_dim, aud_dim, text_dim, d_model,
                         self_num_layers, d_ff)

    visual = jax.random.normal(k_v, (B, T, vis_dim), jnp.float32)
    audio = jax.random.normal(k_a, (B, T, aud_dim), jnp.float32)
    text = jax.random.normal(k_t, (B, T, text_dim), jnp.float32)
    # masks [B, 1, T]: batch 0 fully valid, batch 1 padded in last 2 steps
    masks = jnp.ones((B, 1, T), jnp.float32).at[1, 0, -2:].set(0.0)
    labels = jnp.zeros((B, T), jnp.float32).at[:, 2].set(1.0)
    segments = jax.random.uniform(k_seg, (B, T, 2), jnp.float32)

    batch = {
        "visual_feats": visual,
        "audio_feats": audio,
        "text_feats": text,
        "masks": masks,
        "labels": labels,
        "segments": segments,
    }

    outs = jax.block_until_ready(mmc_forward(params, batch, num_heads))

    m, cls_logits, offsets, gt_lab, gt_off, feats = outs
    assert cls_logits.shape == (B, T, 1)
    assert offsets.shape == (B, T, 2)
    assert feats.shape == (B, T, d_model)
    assert bool(jnp.all(jnp.isfinite(cls_logits)))
    assert bool(jnp.all(jnp.isfinite(offsets)))
    assert bool(jnp.all(offsets >= 0.0))  # reg_head ends with ReLU
    assert bool(jnp.all(feats >= 0.0))    # feature_map ends with ReLU

    print("KERNEL_OK")
</pallas_src>

<mosaic_0001>
module attributes {stable_mosaic.version = 11 : i64} {
  func.func @_input_stage_kernel(%arg0: i32, %arg1: memref<16x32xbf16, #tpu.memory_space<vmem>>, %arg2: memref<32x128xbf16, #tpu.memory_space<vmem>>, %arg3: memref<1x128xf32, #tpu.memory_space<vmem>>, %arg4: memref<1x128xf32, #tpu.memory_space<vmem>>, %arg5: memref<1x128xf32, #tpu.memory_space<vmem>>, %arg6: memref<16x128xf32, #tpu.memory_space<vmem>>, %arg7: memref<16x128xbf16, #tpu.memory_space<vmem>>) attributes {dimension_semantics = [#tpu.dimension_semantics<parallel>], iteration_bounds = array<i64: 1>, scalar_prefetch = 0 : i64, scratch_operands = 0 : i64, tpu.core_type = #tpu.core_type<tc>, window_params = [{transform_indices = @transform_0, window_bounds = array<i64: 16, 32>}, {pipeline_mode = #tpu.pipeline_mode<synchronous>, transform_indices = @transform_1, window_bounds = array<i64: 32, 128>}, {pipeline_mode = #tpu.pipeline_mode<synchronous>, transform_indices = @transform_2, window_bounds = array<i64: 1, 128>}, {pipeline_mode = #tpu.pipeline_mode<synchronous>, transform_indices = @transform_3, window_bounds = array<i64: 1, 128>}, {pipeline_mode = #tpu.pipeline_mode<synchronous>, transform_indices = @transform_4, window_bounds = array<i64: 1, 128>}, {pipeline_mode = #tpu.pipeline_mode<synchronous>, transform_indices = @transform_5, window_bounds = array<i64: 16, 128>}, {transform_indices = @transform_6, window_bounds = array<i64: 16, 128>}]} {
    %c0 = arith.constant 0 : index
    %c0_0 = arith.constant 0 : index
    %0 = vector.load %arg1[%c0, %c0_0] : memref<16x32xbf16, #tpu.memory_space<vmem>>, vector<16x32xbf16>
    %c0_1 = arith.constant 0 : index
    %c0_2 = arith.constant 0 : index
    %1 = vector.load %arg2[%c0_1, %c0_2] : memref<32x128xbf16, #tpu.memory_space<vmem>>, vector<32x128xbf16>
    %cst = arith.constant dense<0.000000e+00> : vector<16x128xf32>
    %2 = tpu.matmul %0, %1, %cst {dimension_numbers = #tpu.dot_dimension_numbers<[1], [0], [0], [1], [0, 0, 1, 1], [], []>} : vector<16x32xbf16>, vector<32x128xbf16>, vector<16x128xf32> -> vector<16x128xf32>
    %c0_3 = arith.constant 0 : index
    %c0_4 = arith.constant 0 : index
    %3 = vector.load %arg3[%c0_3, %c0_4] : memref<1x128xf32, #tpu.memory_space<vmem>>, vector<1x128xf32>
    %4 = vector.broadcast %3 : vector<1x128xf32> to vector<16x128xf32>
    %5 = arith.addf %2, %4 : vector<16x128xf32>
    %c0_5 = arith.constant 0 : index
    %c0_6 = arith.constant 0 : index
    %6 = vector.load %arg4[%c0_5, %c0_6] : memref<1x128xf32, #tpu.memory_space<vmem>>, vector<1x128xf32>
    %c0_7 = arith.constant 0 : index
    %c0_8 = arith.constant 0 : index
    %7 = vector.load %arg5[%c0_7, %c0_8] : memref<1x128xf32, #tpu.memory_space<vmem>>, vector<1x128xf32>
    %cst_9 = arith.constant dense<0.000000e+00> : vector<16xf32>
    %8 = vector.multi_reduction <add>, %5, %cst_9 [1] : vector<16x128xf32> to vector<16xf32>
    %9 = vector.shape_cast %8 : vector<16xf32> to vector<16x1xf32>
    %cst_10 = arith.constant 1.280000e+02 : f32
    %10 = vector.broadcast %cst_10 : f32 to vector<16x1xf32>
    %11 = arith.divf %9, %10 : vector<16x1xf32>
    %12 = vector.broadcast %11 : vector<16x1xf32> to vector<16x128xf32>
    %13 = arith.subf %5, %12 : vector<16x128xf32>
    %14 = arith.mulf %13, %13 : vector<16x128xf32>
    %cst_11 = arith.constant dense<0.000000e+00> : vector<16xf32>
    %15 = vector.multi_reduction <add>, %14, %cst_11 [1] : vector<16x128xf32> to vector<16xf32>
    %16 = vector.shape_cast %15 : vector<16xf32> to vector<16x1xf32>
    %cst_12 = arith.constant 1.280000e+02 : f32
    %17 = vector.broadcast %cst_12 : f32 to vector<16x1xf32>
    %18 = arith.divf %16, %17 : vector<16x1xf32>
    %cst_13 = arith.constant 9.99999974E-6 : f32
    %19 = vector.broadcast %cst_13 : f32 to vector<16x1xf32>
    %20 = arith.addf %18, %19 : vector<16x1xf32>
    %21 = math.rsqrt %20 : vector<16x1xf32>
    %22 = vector.broadcast %21 : vector<16x1xf32> to vector<16x128xf32>
    %23 = arith.mulf %13, %22 : vector<16x128xf32>
    %24 = vector.broadcast %6 : vector<1x128xf32> to vector<16x128xf32>
    %25 = arith.mulf %23, %24 : vector<16x128xf32>
    %26 = vector.broadcast %7 : vector<1x128xf32> to vector<16x128xf32>
    %27 = arith.addf %25, %26 : vector<16x128xf32>
    %c0_14 = arith.constant 0 : index
    %c0_15 = arith.constant 0 : index
    %28 = vector.load %arg6[%c0_14, %c0_15] : memref<16x128xf32, #tpu.memory_space<vmem>>, vector<16x128xf32>
    %29 = arith.addf %27, %28 : vector<16x128xf32>
    %30 = arith.truncf %29 : vector<16x128xf32> to vector<16x128xbf16>
    %c0_16 = arith.constant 0 : index
    %c0_17 = arith.constant 0 : index
    %31 = vector.load %arg7[%c0_16, %c0_17] : memref<16x128xbf16, #tpu.memory_space<vmem>>, vector<16x128xbf16>
    tpu.vector_store %arg7[%c0_16, %c0_17], %30 {strides = array<i32>} : memref<16x128xbf16, #tpu.memory_space<vmem>>, vector<16x128xbf16>,
    return
  }
  func.func @transform_0(%arg0: i32) -> (i32, i32) {
    %c0_i32 = arith.constant 0 : i32
    %c0_i32_0 = arith.constant 0 : i32
    return %arg0, %c0_i32 : i32, i32
  }
  func.func @transform_1(%arg0: i32) -> (i32, i32) {
    %c0_i32 = arith.constant 0 : i32
    %c0_i32_0 = arith.constant 0 : i32
    %c0_i32_1 = arith.constant 0 : i32
    return %c0_i32, %c0_i32_0 : i32, i32
  }
  func.func @transform_2(%arg0: i32) -> (i32, i32) {
    %c0_i32 = arith.constant 0 : i32
    %c0_i32_0 = arith.constant 0 : i32
    %c0_i32_1 = arith.constant 0 : i32
    return %c0_i32, %c0_i32_0 : i32, i32
  }
  func.func @transform_3(%arg0: i32) -> (i32, i32) {
    %c0_i32 = arith.constant 0 : i32
    %c0_i32_0 = arith.constant 0 : i32
    %c0_i32_1 = arith.constant 0 : i32
    return %c0_i32, %c0_i32_0 : i32, i32
  }
  func.func @transform_4(%arg0: i32) -> (i32, i32) {
    %c0_i32 = arith.constant 0 : i32
    %c0_i32_0 = arith.constant 0 : i32
    %c0_i32_1 = arith.constant 0 : i32
    return %c0_i32, %c0_i32_0 : i32, i32
  }
  func.func @transform_5(%arg0: i32) -> (i32, i32) {
    %c0_i32 = arith.constant 0 : i32
    %c0_i32_0 = arith.constant 0 : i32
    %c0_i32_1 = arith.constant 0 : i32
    return %c0_i32, %c0_i32_0 : i32, i32
  }
  func.func @transform_6(%arg0: i32) -> (i32, i32) {
    %c0_i32 = arith.constant 0 : i32
    %c0_i32_0 = arith.constant 0 : i32
    return %arg0, %c0_i32 : i32, i32
  }
}

</mosaic_0001>

<bundles_post_ra>
// kernel: tpu_custom_call.1
= control target key start
LH: loop header
LB: loop body
LE: loop exit
PB: predicated region body
PF: predicated region fallthrough
CT: control target
= control target key end

     0   :  { %11 = vsyncpa [#allocation3], 0  ;;  %s467_s0 = inlined_call_operand.hbm [shape: bf16[16,32], index: 0, kind: input, shape index: {}]   ;;  %s468_s1 = inlined_call_operand.hbm [shape: bf16[32,128], index: 1, kind: input, shape index: {}]   ;;  %s469_s2 = inlined_call_operand.vmem [shape: f32[1,128], index: 2, kind: input, shape index: {}]   ;;  %s470_s3 = inlined_call_operand.vmem [shape: f32[1,128], index: 3, kind: input, shape index: {}]   ;;  %s471_s4 = inlined_call_operand.hbm [shape: f32[1,128], index: 4, kind: input, shape index: {}]   ;;  %s472_s5 = inlined_call_operand.vmem [shape: f32[16,128], index: 5, kind: input, shape index: {}]   ;;  %s473_s6 = inlined_call_operand.hbm [shape: bf16[16,128], index: 6, kind: output, shape index: {}]  }
   0x1   :  { %12 = vsyncpa [#allocation6], 0 }
   0x2   :  { %13 = vsyncpa [#allocation4], 0  ;;  %s348_s21 = smov [#allocation5]   ;;  %s349_s23 = smov [#allocation2]  }
   0x3   :  { %s31_s22 = sshll.u32 %s348_s21, 4  ;;  %s19_s24 = sshll.u32 %s349_s23, 4  ;;  %s32_s22 = int_to_ptr.vmem [resolvable:$true] %s31_s22  ;;  %s391_s24 = int_to_ptr.vmem [resolvable:$true] %s19_s24 }
   0x4   :  { %s254_s27 = scalar_lea.hbm %s468_s1, 256 }
   0x5   :  { %p255_p0 = scmp.ne.s32.totalorder %s468_s1, %s254_s27  ;;  %p258_p1 = scmp.lt.u32.totalorder %s254_s27, %s468_s1 }
   0x7   :  { %p260_p2 = pnand %p258_p1, %p255_p0 }
   0x9   :  { %263 = shalt.err (!%p260_p2)
}
   0xa   :  { %s264_s8 = scalar_lea.vmem %s32_s22, 256  ;;  %p269_p4 = scmp.lt.s32.totalorder %s32_s22, %s32_s22 }
   0xb   :  { %p265_p3 = scmp.ne.s32.totalorder %s32_s22, %s264_s8  ;;  %p270_p5 = scmp.lt.s32.totalorder %s264_s8, %s264_s8 }
   0xd   :  { %p271_p6 = por %p270_p5, %p269_p4 }
   0xf   :  { %p272_p7 = pnand %p271_p6, %p265_p3 }
  0x11   :  { %275 = shalt.err (!%p272_p7)
}
  0x12   :  { %s350_s9 = smov 64   ;;  %s351_s10 = smov 4  }
  0x13   :  { %37 = dma.hbm_to_vmem [thread:$0]  %s468_s1, 256, %s32_s22, [#allocation6], %s350_s9, %s350_s9, %s351_s10  }
  0x14   :  { %s276_s15 = scalar_lea.hbm %s467_s0, 128 }
  0x15   :  { %p277_p8 = scmp.ne.s32.totalorder %s467_s0, %s276_s15  ;;  %p280_p9 = scmp.lt.u32.totalorder %s276_s15, %s467_s0 }
  0x17   :  { %p282_p10 = pnand %p280_p9, %p277_p8 }
  0x19   :  { %285 = shalt.err (!%p282_p10)
}
  0x1a   :  { %s286_s20 = scalar_lea.vmem %s391_s24, 128  ;;  %p291_p12 = scmp.lt.s32.totalorder %s391_s24, %s391_s24 }
  0x1b   :  { %p287_p11 = scmp.ne.s32.totalorder %s391_s24, %s286_s20  ;;  %p292_p13 = scmp.lt.s32.totalorder %s286_s20, %s286_s20 }
  0x1d   :  { %p293_p0 = por %p292_p13, %p291_p12 }
  0x1f   :  { %p294_p1 = pnand %p293_p0, %p287_p11 }
  0x21   :  { %297 = shalt.err (!%p294_p1)
}
  0x22   :  { %25 = dma.hbm_to_vmem [thread:$0]  %s467_s0, 128, %s391_s24, [#allocation3], %s350_s9, %s350_s9, %s351_s10  }
  0x23   :  { %s352_s22 = smov [#allocation7]   ;;  %s298_s27 = scalar_lea.hbm %s471_s4, 16 }
  0x24   :  { %s48_s23 = sshll.u32 %s352_s22, 4  ;;  %p299_p2 = scmp.ne.s32.totalorder %s471_s4, %s298_s27  ;;  %s49_s23 = int_to_ptr.vmem [resolvable:$true] %s48_s23 }
  0x25   :  { %p302_p3 = scmp.lt.u32.totalorder %s298_s27, %s471_s4 }
  0x27   :  { %p304_p4 = pnand %p302_p3, %p299_p2 }
  0x29   :  { %307 = shalt.err (!%p304_p4)
}
  0x2a   :  { %s308_s8 = scalar_lea.vmem %s49_s23, 16  ;;  %s312_s0 = scalar_lea.vmem %s49_s23, 32 }
  0x2b   :  { %p309_p5 = scmp.ne.s32.totalorder %s49_s23, %s308_s8  ;;  %p313_p6 = scmp.lt.s32.totalorder %s49_s23, %s49_s23 }
  0x2c   :  { %p314_p7 = scmp.lt.s32.totalorder %s312_s0, %s308_s8 }
  0x2e   :  { %p315_p8 = por %p314_p7, %p313_p6 }
  0x30   :  { %p316_p9 = pnand %p315_p8, %p309_p5 }
  0x32   :  { %319 = shalt.err (!%p316_p9)
}
  0x33   :  { %51 = dma.hbm_to_vmem [thread:$0]  %s471_s4, 16, %s49_s23, [#allocation6]  }
  0x34   :  { %342 = dma.done.wait [#allocation3], 128  }
  0x35   :  { %343 = vsyncadd [#allocation3], 4294967168 }
  0x36   :  { %344 = dma.done.wait [#allocation6], 272  }
  0x37   :  { %345 = vsyncadd [#allocation6], 4294967024  ;;  %v353_v0 = vmov 0.0   ;;  %vm354_vm0 = vmmov 0   ;;  %v247_v1 = vld [vmem:[#allocation5] sm:$0xff]   ;;  %v248_v2 = vld [vmem:[#allocation5 + $0x8] sm:$0xff]  }
  0x38   :  { %231 = vmatprep.subr.bf16.mxu0 %v353_v0  ;;  %235 = vmatprep.mubr.msk.bf16.mxu0 %vm354_vm0, %v353_v0  ;;  %v249_v3 = vld [vmem:[#allocation2] sm:$0xff]   ;;  %vm94_vm1 = vcmask 261120   ;;  %v212_v4 = vld [vmem:[%s469_s2] ss:$0 sm:$0xff]  ;;  %v218_v30 = vld [vmem:[#allocation7] ss:$0 sm:$0xff] }
  0x39   :  { %232 = vmatpush3.bf16.msra.mxu0 %v247_v1  ;;  %v217_v26 = vld [vmem:[%s470_s3] ss:$0 sm:$0xff]  ;;  %v181_v35 = vld [vmem:[%s472_s5 + $0x8] sm:$0xff]  ;;  %s355_s18 = smov [#allocation8]  }
  0x3a   :  { %233 = vmatprep.subr.bf16.mxu0 %v353_v0  ;;  %v180_v34 = vld [vmem:[%s472_s5] sm:$0xff]  ;;  %s199_s19 = sshll.u32 %s355_s18, 4  ;;  %s200_s19 = int_to_ptr.vmem [resolvable:$true] %s199_s19 }
  0x3b   :  { %s320_s3 = scalar_lea.vmem %s200_s19, 128  ;;  %p325_p11 = scmp.lt.s32.totalorder %s200_s19, %s200_s19 }
  0x3c   :  { %p321_p10 = scmp.ne.s32.totalorder %s200_s19, %s320_s3  ;;  %p326_p12 = scmp.lt.s32.totalorder %s320_s3, %s320_s3 }
  0x3d   :  { %234 = vmatpush3.bf16.msra.mxu0 %v248_v2 }
  0x3e   :  { %p327_p13 = por %p326_p12, %p325_p11 }
  0x40   :  { %236 = vmatmul.mubr.msk.bf16.vlgmr.msra.gmra.mrb[0].mxu0 %vm94_vm1, %v249_v3  ;;  %p328_p0 = pnand %p327_p13, %p321_p10 }
 0x113   :  { %v132_v5 = vpop.f32.mrb[0].mxu0 }
 0x114   :  { %v133_v6 = vadd.f32 %v212_v4, %v132_v5  ;;  %v237_v7 = vpop.f32.mrb[1].mxu0 }
 0x115   :  { %v135_v8 = vpop.f32.mrb[2].mxu0 }
 0x116   :  { %141 = vadd.xlane.f32.xlu0 %v133_v6  ;;  %v238_v9 = vpop.f32.mrb[3].mxu0  ;;  %v136_v10 = vadd.f32 %v212_v4, %v135_v8 }
 0x11a   :  { %143 = vadd.xlane.f32.xlu0 %v136_v10 }
 0x1a3   :  { %v142_v11 = vpop.xlane.xlu0 %141 }
 0x1a4   :  { %v146_v12 = vmul.f32 0.0078125, %v142_v11 }
 0x1a6   :  { %v148_v13 = vsub.f32 %v133_v6, %v146_v12 }
 0x1a7   :  { %v144_v14 = vpop.xlane.xlu0 %143 }
 0x1a8   :  { %v147_v15 = vmul.f32 0.0078125, %v144_v14  ;;  %v150_v16 = vmul.f32 %v148_v13, %v148_v13 }
 0x1aa   :  { %v149_v17 = vsub.f32 %v136_v10, %v147_v15  ;;  %152 = vadd.xlane.f32.xlu1 %v150_v16 }
 0x1ac   :  { %v151_v18 = vmul.f32 %v149_v17, %v149_v17 }
 0x1ae   :  { %154 = vadd.xlane.f32.xlu1 %v151_v18 }
 0x237   :  { %v153_v19 = vpop.xlane.xlu1 %152 }
 0x238   :  { %v156_v20 = vmul.f32 0.0078125, %v153_v19 }
 0x23a   :  { %v158_v21 = vadd.f32 1e-05, %v156_v20 }
 0x23b   :  { %v155_v22 = vpop.xlane.xlu1 %154 }
 0x23c   :  { %250 = vrsqrt.f32 %v158_v21  ;;  %v157_v23 = vmul.f32 0.0078125, %v155_v22 }
 0x23e   :  { %v159_v24 = vadd.f32 1e-05, %v157_v23 }
 0x240   :  { %252 = vrsqrt.f32 %v159_v24 }
 0x246   :  { %v251_v25 = vpop.eup %250 }
 0x247   :  { %v162_v27 = vmul.f32 %v251_v25, %v148_v13 }
 0x249   :  { %v170_v28 = vmul.f32 %v217_v26, %v162_v27 }
 0x24a   :  { %v253_v29 = vpop.eup %252 }
 0x24b   :  { %v163_v31 = vmul.f32 %v253_v29, %v149_v17  ;;  %v178_v33 = vadd.f32 %v218_v30, %v170_v28 }
 0x24d   :  { %v171_v32 = vmul.f32 %v217_v26, %v163_v31  ;;  %v182_v37 = vadd.f32 %v180_v34, %v178_v33 }
 0x24f   :  { %v179_v36 = vadd.f32 %v218_v30, %v171_v32 }
 0x251   :  { %v183_v38 = vadd.f32 %v181_v35, %v179_v36 }
 0x253   :  { %v226_v39 = vpack.c.bf16 %v183_v38, %v182_v37 }
 0x255   :  { %227 = vst [vmem:[#allocation8] sm:$0xff] %v226_v39  }
 0x256   :  { %331 = shalt.err (!%p328_p0)
}
 0x257   :  { %s332_s21 = scalar_lea.hbm %s473_s6, 128 }
 0x258   :  { %p333_p1 = scmp.ne.s32.totalorder %s473_s6, %s332_s21  ;;  %p336_p2 = scmp.lt.u32.totalorder %s332_s21, %s473_s6 }
 0x25a   :  { %p338_p3 = pnand %p336_p2, %p333_p1 }
 0x25c   :  { %341 = shalt.err (!%p338_p3)
}
 0x25d   :  { %205 = dma.vmem_to_hbm [thread:$0]  %s200_s19, 128, %s473_s6, [#allocation4], %s350_s9, %s350_s9, %s351_s10  }
 0x25e   :  { %346 = dma.done.wait [#allocation4], 128  }
 0x25f   :  { %347 = vsyncadd [#allocation4], 4294967168 }
 0x260   :  { %209 = vsyncpa [#allocation3], 1 }
 0x261   :  { %210 = vsyncpa [#allocation6], 1 }
 0x262   :  { %211 = vsyncpa [#allocation4], 1 }

</bundles_post_ra>
